<compile_context>
chip_gen: v6e
topology: v6e:2x2x1
jax: 0.10.0
libtpu: 0.0.40
codegen_flags: <defaults>
</compile_context>

<pallas_src>
import jax
import jax.numpy as jnp
from jax.experimental import pallas as pl
from jax.experimental.pallas import tpu as pltpu


def _round_up(x, m):
    return (x + m - 1) // m * m


def ffn_kernel(x_ref, w1_ref, b1_ref, w2_ref, b2_ref, gamma_ref, beta_ref,
               o_ref, acc_ref):
    """One (row-tile i, hidden-tile k) grid step.

    x_ref:      (TR, d_in)   activations (kept in input dtype; residual done in f32)
    w1_ref:     (d_in, TH)   bf16
    b1_ref:     (1, TH)      f32
    w2_ref:     (TH, d_in)   bf16
    b2_ref:     (1, d_in)    f32
    gamma/beta: (1, d_in)    f32
    o_ref:      (TR, d_in)   output tile (resident across the k axis)
    acc_ref:    (TR, d_in)   f32 accumulator scratch
    """
    k = pl.program_id(1)
    nk = pl.num_programs(1)

    @pl.when(k == 0)
    def _():
        acc_ref[...] = jnp.zeros_like(acc_ref)

    # bf16 operands into the MXU, f32 accumulation.
    x_bf = x_ref[...].astype(jnp.bfloat16)
    h = jnp.dot(x_bf, w1_ref[...], preferred_element_type=jnp.float32)
    h = jnp.maximum(h + b1_ref[...], 0.0)            # bias + ReLU in f32 (VPU)
    acc_ref[...] += jnp.dot(h.astype(jnp.bfloat16), w2_ref[...],
                            preferred_element_type=jnp.float32)

    @pl.when(k == nk - 1)
    def _():
        # second bias + dropout(identity, eval) + residual, all in f32
        y = acc_ref[...] + b2_ref[...] + x_ref[...].astype(jnp.float32)
        # LayerNorm over d_in, eps = 1e-5, one-pass variance
        mean = jnp.mean(y, axis=-1, keepdims=True)
        mean_sq = jnp.mean(y * y, axis=-1, keepdims=True)
        var = mean_sq - mean * mean
        y_hat = (y - mean) * jax.lax.rsqrt(var + 1e-5)
        o_ref[...] = (y_hat * gamma_ref[...] + beta_ref[...]).astype(o_ref.dtype)


def positionwise_ffn(x, w1, b1, w2, b2, gamma, beta, *,
                     tile_rows=256, tile_hid=512):
    """x: (B, L, d_in).  w1: (d_in, d_hid), w2: (d_hid, d_in)."""
    B, L, d_in = x.shape
    d_hid = w1.shape[1]
    N = B * L

    # Clamp tiles to the problem; rows stay a multiple of 8 (sublane),
    # hidden tile a multiple of 128 (lane) unless the full dim is smaller.
    tile_rows = min(tile_rows, _round_up(N, 8))
    tile_hid = d_hid if d_hid <= tile_hid else tile_hid

    Np = _round_up(N, tile_rows)          # pad rows (zero rows, sliced off at the end)
    Hp = _round_up(d_hid, tile_hid)       # pad hidden (zero cols/rows -> contribute 0)

    x2d = jnp.pad(x.reshape(N, d_in), ((0, Np - N), (0, 0)))
    w1_p = jnp.pad(w1, ((0, 0), (0, Hp - d_hid))).astype(jnp.bfloat16)
    b1_p = jnp.pad(b1, (0, Hp - d_hid)).reshape(1, Hp).astype(jnp.float32)
    w2_p = jnp.pad(w2, ((0, Hp - d_hid), (0, 0))).astype(jnp.bfloat16)
    b2_2d = b2.reshape(1, d_in).astype(jnp.float32)
    g_2d = gamma.reshape(1, d_in).astype(jnp.float32)
    be_2d = beta.reshape(1, d_in).astype(jnp.float32)

    # VMEM budget: 2x double-buffered x/out tiles, 2x bf16 weight tiles, f32 acc,
    # plus the in-kernel (TR, TH) intermediate; 2x headroom for compiler scratch.
    itemsize = jnp.dtype(x.dtype).itemsize
    est = (2 * tile_rows * d_in * itemsize            # x (double-buffered)
           + 2 * tile_rows * d_in * itemsize          # out (double-buffered)
           + 2 * d_in * tile_hid * 2                  # W1 bf16
           + 2 * tile_hid * d_in * 2                  # W2 bf16
           + 2 * (tile_hid + 3 * d_in) * 4            # biases / gamma / beta
           + tile_rows * d_in * 4                     # accumulator scratch
           + tile_rows * tile_hid * (4 + 2))          # h (f32) + h (bf16)
    vmem_limit = min(max(32 * 1024 * 1024, 2 * est), 128 * 1024 * 1024)

    out = pl.pallas_call(
        ffn_kernel,
        out_shape=jax.ShapeDtypeStruct((Np, d_in), x.dtype),
        grid_spec=pltpu.PrefetchScalarGridSpec(
            num_scalar_prefetch=0,
            grid=(Np // tile_rows, Hp // tile_hid),
            in_specs=[
                pl.BlockSpec((tile_rows, d_in), lambda i, k: (i, 0)),   # x rows
                pl.BlockSpec((d_in, tile_hid), lambda i, k: (0, k)),    # W1 tile
                pl.BlockSpec((1, tile_hid), lambda i, k: (0, k)),       # b1 tile
                pl.BlockSpec((tile_hid, d_in), lambda i, k: (k, 0)),    # W2 tile
                pl.BlockSpec((1, d_in), lambda i, k: (0, 0)),           # b2
                pl.BlockSpec((1, d_in), lambda i, k: (0, 0)),           # gamma
                pl.BlockSpec((1, d_in), lambda i, k: (0, 0)),           # beta
            ],
            out_specs=pl.BlockSpec((tile_rows, d_in), lambda i, k: (i, 0)),
            scratch_shapes=[pltpu.VMEM((tile_rows, d_in), jnp.float32)],
        ),
        compiler_params=pltpu.CompilerParams(
            dimension_semantics=("parallel", "arbitrary"),
            vmem_limit_bytes=int(vmem_limit),
        ),
    )(x2d, w1_p, b1_p, w2_p, b2_2d, g_2d, be_2d)
    return out[:N].reshape(B, L, d_in)


def reference(x, w1, b1, w2, b2, gamma, beta):
    h = jnp.maximum(jnp.einsum("bld,dh->blh", x, w1) + b1, 0.0)
    y = jnp.einsum("blh,hd->bld", h, w2) + b2
    y = y + x
    mean = jnp.mean(y, axis=-1, keepdims=True)
    var = jnp.mean((y - mean) ** 2, axis=-1, keepdims=True)
    return (y - mean) * jax.lax.rsqrt(var + 1e-5) * gamma + beta


if __name__ == "__main__":
    B, L, d_in, d_hid = 2, 8, 32, 64

    key = jax.random.PRNGKey(0)
    kx, k1, k2, k3, k4 = jax.random.split(key, 5)

    x = jax.random.normal(kx, (B, L, d_in), dtype=jnp.float32)

    # Conv1d(d_in, d_hid, 1).weight has shape (d_hid, d_in, 1); we store the
    # kernel-size-1 squeeze transposed as (d_in, d_hid) so the kernel does x @ W1.
    w1 = jax.random.normal(k1, (d_in, d_hid), dtype=jnp.float32) * 0.1
    b1 = jax.random.normal(k2, (d_hid,), dtype=jnp.float32) * 0.1
    w2 = jax.random.normal(k3, (d_hid, d_in), dtype=jnp.float32) * 0.1
    b2 = jax.random.normal(k4, (d_in,), dtype=jnp.float32) * 0.1
    gamma = jnp.ones((d_in,), dtype=jnp.float32)
    beta = jnp.zeros((d_in,), dtype=jnp.float32)

    out = positionwise_ffn(x, w1, b1, w2, b2, gamma, beta)
    out = jax.block_until_ready(out)

    ref = reference(x, w1, b1, w2, b2, gamma, beta)
    assert out.shape == (B, L, d_in)
    # bf16 MXU operands (f32 accumulation) => compare against the f32 reference
    # with a bf16-appropriate tolerance.
    assert jnp.allclose(out, ref, atol=2e-2, rtol=2e-2), "mismatch vs reference"

    print("KERNEL_OK")
</pallas_src>

<mosaic_0001>
module attributes {stable_mosaic.version = 11 : i64} {
  func.func @ffn_kernel(%arg0: i32, %arg1: i32, %arg2: memref<16x32xf32, #tpu.memory_space<vmem>>, %arg3: memref<32x64xbf16, #tpu.memory_space<vmem>>, %arg4: memref<1x64xf32, #tpu.memory_space<vmem>>, %arg5: memref<64x32xbf16, #tpu.memory_space<vmem>>, %arg6: memref<1x32xf32, #tpu.memory_space<vmem>>, %arg7: memref<1x32xf32, #tpu.memory_space<vmem>>, %arg8: memref<1x32xf32, #tpu.memory_space<vmem>>, %arg9: memref<16x32xf32, #tpu.memory_space<vmem>>, %arg10: memref<16x32xf32, #tpu.memory_space<vmem>>) attributes {dimension_semantics = [#tpu.dimension_semantics<parallel>, #tpu.dimension_semantics<arbitrary>], iteration_bounds = array<i64: 1, 1>, scalar_prefetch = 0 : i64, scratch_operands = 1 : i64, tpu.core_type = #tpu.core_type<tc>, window_params = [{transform_indices = @transform_0, window_bounds = array<i64: 16, 32>}, {transform_indices = @transform_1, window_bounds = array<i64: 32, 64>}, {transform_indices = @transform_2, window_bounds = array<i64: 1, 64>}, {transform_indices = @transform_3, window_bounds = array<i64: 64, 32>}, {pipeline_mode = #tpu.pipeline_mode<synchronous>, transform_indices = @transform_4, window_bounds = array<i64: 1, 32>}, {pipeline_mode = #tpu.pipeline_mode<synchronous>, transform_indices = @transform_5, window_bounds = array<i64: 1, 32>}, {pipeline_mode = #tpu.pipeline_mode<synchronous>, transform_indices = @transform_6, window_bounds = array<i64: 1, 32>}, {transform_indices = @transform_7, window_bounds = array<i64: 16, 32>}]} {
    %c0_i32 = arith.constant 0 : i32
    %0 = arith.cmpi eq, %arg1, %c0_i32 : i32
    %1 = arith.extui %0 : i1 to i32
    %c0_i32_0 = arith.constant 0 : i32
    %2 = arith.cmpi ne, %1, %c0_i32_0 : i32
    scf.if %2 {
      %cst_16 = arith.constant 0.000000e+00 : f32
      %21 = vector.broadcast %cst_16 : f32 to vector<16x32xf32>
      %c0_17 = arith.constant 0 : index
      %c0_18 = arith.constant 0 : index
      %22 = vector.load %arg10[%c0_17, %c0_18] : memref<16x32xf32, #tpu.memory_space<vmem>>, vector<16x32xf32>
      tpu.vector_store %arg10[%c0_17, %c0_18], %21 {strides = array<i32>} : memref<16x32xf32, #tpu.memory_space<vmem>>, vector<16x32xf32>,
    } else {
    }
    %c0 = arith.constant 0 : index
    %c0_1 = arith.constant 0 : index
    %3 = vector.load %arg2[%c0, %c0_1] : memref<16x32xf32, #tpu.memory_space<vmem>>, vector<16x32xf32>
    %4 = arith.truncf %3 : vector<16x32xf32> to vector<16x32xbf16>
    %c0_2 = arith.constant 0 : index
    %c0_3 = arith.constant 0 : index
    %5 = vector.load %arg3[%c0_2, %c0_3] : memref<32x64xbf16, #tpu.memory_space<vmem>>, vector<32x64xbf16>
    %cst = arith.constant dense<0.000000e+00> : vector<16x64xf32>
    %6 = tpu.matmul %4, %5, %cst {dimension_numbers = #tpu.dot_dimension_numbers<[1], [0], [0], [1], [0, 0, 1, 1], [], []>} : vector<16x32xbf16>, vector<32x64xbf16>, vector<16x64xf32> -> vector<16x64xf32>
    %c0_4 = arith.constant 0 : index
    %c0_5 = arith.constant 0 : index
    %7 = vector.load %arg4[%c0_4, %c0_5] : memref<1x64xf32, #tpu.memory_space<vmem>>, vector<1x64xf32>
    %8 = vector.broadcast %7 : vector<1x64xf32> to vector<16x64xf32>
    %9 = arith.addf %6, %8 : vector<16x64xf32>
    %cst_6 = arith.constant 0.000000e+00 : f32
    %10 = vector.broadcast %cst_6 : f32 to vector<16x64xf32>
    %11 = arith.maximumf %9, %10 : vector<16x64xf32>
    %c0_7 = arith.constant 0 : index
    %c0_8 = arith.constant 0 : index
    %12 = vector.load %arg10[%c0_7, %c0_8] : memref<16x32xf32, #tpu.memory_space<vmem>>, vector<16x32xf32>
    %13 = arith.truncf %11 : vector<16x64xf32> to vector<16x64xbf16>
    %c0_9 = arith.constant 0 : index
    %c0_10 = arith.constant 0 : index
    %14 = vector.load %arg5[%c0_9, %c0_10] : memref<64x32xbf16, #tpu.memory_space<vmem>>, vector<64x32xbf16>
    %cst_11 = arith.constant dense<0.000000e+00> : vector<16x32xf32>
    %15 = tpu.matmul %13, %14, %cst_11 {dimension_numbers = #tpu.dot_dimension_numbers<[1], [0], [0], [1], [0, 0, 1, 1], [], []>} : vector<16x64xbf16>, vector<64x32xbf16>, vector<16x32xf32> -> vector<16x32xf32>
    %16 = arith.addf %12, %15 : vector<16x32xf32>
    %c0_12 = arith.constant 0 : index
    %c0_13 = arith.constant 0 : index
    %17 = vector.load %arg10[%c0_12, %c0_13] : memref<16x32xf32, #tpu.memory_space<vmem>>, vector<16x32xf32>
    tpu.vector_store %arg10[%c0_12, %c0_13], %16 {strides = array<i32>} : memref<16x32xf32, #tpu.memory_space<vmem>>, vector<16x32xf32>,
    %c0_i32_14 = arith.constant 0 : i32
    %18 = arith.cmpi eq, %arg1, %c0_i32_14 : i32
    %19 = arith.extui %18 : i1 to i32
    %c0_i32_15 = arith.constant 0 : i32
    %20 = arith.cmpi ne, %19, %c0_i32_15 : i32
    scf.if %20 {
      %c0_16 = arith.constant 0 : index
      %c0_17 = arith.constant 0 : index
      %21 = vector.load %arg10[%c0_16, %c0_17] : memref<16x32xf32, #tpu.memory_space<vmem>>, vector<16x32xf32>
      %c0_18 = arith.constant 0 : index
      %c0_19 = arith.constant 0 : index
      %22 = vector.load %arg6[%c0_18, %c0_19] : memref<1x32xf32, #tpu.memory_space<vmem>>, vector<1x32xf32>
      %23 = vector.broadcast %22 : vector<1x32xf32> to vector<16x32xf32>
      %24 = arith.addf %21, %23 : vector<16x32xf32>
      %c0_20 = arith.constant 0 : index
      %c0_21 = arith.constant 0 : index
      %25 = vector.load %arg2[%c0_20, %c0_21] : memref<16x32xf32, #tpu.memory_space<vmem>>, vector<16x32xf32>
      %26 = arith.addf %24, %25 : vector<16x32xf32>
      %cst_22 = arith.constant dense<0.000000e+00> : vector<16xf32>
      %27 = vector.multi_reduction <add>, %26, %cst_22 [1] : vector<16x32xf32> to vector<16xf32>
      %28 = vector.shape_cast %27 : vector<16xf32> to vector<16x1xf32>
      %cst_23 = arith.constant 3.200000e+01 : f32
      %29 = vector.broadcast %cst_23 : f32 to vector<16x1xf32>
      %30 = arith.divf %28, %29 : vector<16x1xf32>
      %31 = arith.mulf %26, %26 : vector<16x32xf32>
      %cst_24 = arith.constant dense<0.000000e+00> : vector<16xf32>
      %32 = vector.multi_reduction <add>, %31, %cst_24 [1] : vector<16x32xf32> to vector<16xf32>
      %33 = vector.shape_cast %32 : vector<16xf32> to vector<16x1xf32>
      %cst_25 = arith.constant 3.200000e+01 : f32
      %34 = vector.broadcast %cst_25 : f32 to vector<16x1xf32>
      %35 = arith.divf %33, %34 : vector<16x1xf32>
      %36 = arith.mulf %30, %30 : vector<16x1xf32>
      %37 = arith.subf %35, %36 : vector<16x1xf32>
      %38 = vector.broadcast %30 : vector<16x1xf32> to vector<16x32xf32>
      %39 = arith.subf %26, %38 : vector<16x32xf32>
      %cst_26 = arith.constant 9.99999974E-6 : f32
      %40 = vector.broadcast %cst_26 : f32 to vector<16x1xf32>
      %41 = arith.addf %37, %40 : vector<16x1xf32>
      %42 = math.rsqrt %41 : vector<16x1xf32>
      %43 = vector.broadcast %42 : vector<16x1xf32> to vector<16x32xf32>
      %44 = arith.mulf %39, %43 : vector<16x32xf32>
      %c0_27 = arith.constant 0 : index
      %c0_28 = arith.constant 0 : index
      %45 = vector.load %arg7[%c0_27, %c0_28] : memref<1x32xf32, #tpu.memory_space<vmem>>, vector<1x32xf32>
      %46 = vector.broadcast %45 : vector<1x32xf32> to vector<16x32xf32>
      %47 = arith.mulf %44, %46 : vector<16x32xf32>
      %c0_29 = arith.constant 0 : index
      %c0_30 = arith.constant 0 : index
      %48 = vector.load %arg8[%c0_29, %c0_30] : memref<1x32xf32, #tpu.memory_space<vmem>>, vector<1x32xf32>
      %49 = vector.broadcast %48 : vector<1x32xf32> to vector<16x32xf32>
      %50 = arith.addf %47, %49 : vector<16x32xf32>
      %c0_31 = arith.constant 0 : index
      %c0_32 = arith.constant 0 : index
      %51 = vector.load %arg9[%c0_31, %c0_32] : memref<16x32xf32, #tpu.memory_space<vmem>>, vector<16x32xf32>
      tpu.vector_store %arg9[%c0_31, %c0_32], %50 {strides = array<i32>} : memref<16x32xf32, #tpu.memory_space<vmem>>, vector<16x32xf32>,
    } else {
    }
    return
  }
  func.func @transform_0(%arg0: i32, %arg1: i32) -> (i32, i32) {
    %c0_i32 = arith.constant 0 : i32
    %c0_i32_0 = arith.constant 0 : i32
    return %arg0, %c0_i32 : i32, i32
  }
  func.func @transform_1(%arg0: i32, %arg1: i32) -> (i32, i32) {
    %c0_i32 = arith.constant 0 : i32
    %c0_i32_0 = arith.constant 0 : i32
    return %c0_i32, %arg1 : i32, i32
  }
  func.func @transform_2(%arg0: i32, %arg1: i32) -> (i32, i32) {
    %c0_i32 = arith.constant 0 : i32
    %c0_i32_0 = arith.constant 0 : i32
    return %c0_i32, %arg1 : i32, i32
  }
  func.func @transform_3(%arg0: i32, %arg1: i32) -> (i32, i32) {
    %c0_i32 = arith.constant 0 : i32
    %c0_i32_0 = arith.constant 0 : i32
    return %arg1, %c0_i32 : i32, i32
  }
  func.func @transform_4(%arg0: i32, %arg1: i32) -> (i32, i32) {
    %c0_i32 = arith.constant 0 : i32
    %c0_i32_0 = arith.constant 0 : i32
    %c0_i32_1 = arith.constant 0 : i32
    return %c0_i32, %c0_i32_0 : i32, i32
  }
  func.func @transform_5(%arg0: i32, %arg1: i32) -> (i32, i32) {
    %c0_i32 = arith.constant 0 : i32
    %c0_i32_0 = arith.constant 0 : i32
    %c0_i32_1 = arith.constant 0 : i32
    return %c0_i32, %c0_i32_0 : i32, i32
  }
  func.func @transform_6(%arg0: i32, %arg1: i32) -> (i32, i32) {
    %c0_i32 = arith.constant 0 : i32
    %c0_i32_0 = arith.constant 0 : i32
    %c0_i32_1 = arith.constant 0 : i32
    return %c0_i32, %c0_i32_0 : i32, i32
  }
  func.func @transform_7(%arg0: i32, %arg1: i32) -> (i32, i32) {
    %c0_i32 = arith.constant 0 : i32
    %c0_i32_0 = arith.constant 0 : i32
    return %arg0, %c0_i32 : i32, i32
  }
}

</mosaic_0001>

<bundles_post_ra>
// kernel: tpu_custom_call.1
= control target key start
LH: loop header
LB: loop body
LE: loop exit
PB: predicated region body
PF: predicated region fallthrough
CT: control target
= control target key end

     0   :  { %v354_v1 = vmov 0.0   ;;  %vm355_vm0 = vmmov 0   ;;  %vm32_vm1 = vcmask 261120   ;;  %s449_s0 = inlined_call_operand.vmem [shape: f32[16,32], index: 0, kind: input, shape index: {}]   ;;  %s450_s1 = inlined_call_operand.vmem [shape: bf16[32,64], index: 1, kind: input, shape index: {}]   ;;  %s451_s2 = inlined_call_operand.vmem [shape: f32[1,64], index: 2, kind: input, shape index: {}]   ;;  %s452_s3 = inlined_call_operand.vmem [shape: bf16[64,32], index: 3, kind: input, shape index: {}]   ;;  %s453_s4 = inlined_call_operand.vmem [shape: f32[1,32], index: 4, kind: input, shape index: {}]   ;;  %s454_s5 = inlined_call_operand.vmem [shape: f32[1,32], index: 5, kind: input, shape index: {}]   ;;  %s455_s6 = inlined_call_operand.vmem [shape: f32[1,32], index: 6, kind: input, shape index: {}]   ;;  %s456_s7 = inlined_call_operand.hbm [shape: f32[16,32], index: 7, kind: output, shape index: {}]  }
   0x1   :  { %v322_v0 = vld [vmem:[%s450_s1 + $0x8] sm:$0xff]   ;;  %297 = vmatprep.subr.bf16.mxu0 %v354_v1  ;;  %v323_v2 = vld [vmem:[%s450_s1] sm:$0xff]   ;;  %305 = vmatprep.subr.bf16.mxu1 %v354_v1  ;;  %33 = vst.msk [vmem:[#allocation2] sm:$0xff] %vm32_vm1, %v354_v1  ;;  %34 = vst.msk [vmem:[#allocation2 + $0x8] sm:$0xff] %vm32_vm1, %v354_v1 }
   0x2   :  { %298 = vmatpush3.bf16.msra.mxu0 %v322_v0  ;;  %301 = vmatprep.mubr.msk.bf16.mxu0 %vm355_vm0, %v354_v1  ;;  %v35_v3 = vld [vmem:[%s449_s0] sm:$0xff]  ;;  %v36_v4 = vld [vmem:[%s449_s0 + $0x8] sm:$0xff]  ;;  %v324_v5 = vld [vmem:[%s452_s3 + $0x18] sm:$0xff]  }
   0x3   :  { %299 = vmatprep.subr.bf16.mxu0 %v354_v1  ;;  %313 = vmatprep.mubr.msk.bf16.mxu1 %vm355_vm0, %v354_v1  ;;  %v37_v6 = vpack.c.bf16 %v36_v4, %v35_v3 }
   0x4   :  { %306 = vmatpush3.bf16.msra.mxu1 %v324_v5 }
   0x5   :  { %307 = vmatprep.subr.bf16.mxu1 %v354_v1 }
   0x6   :  { %300 = vmatpush3.bf16.msra.mxu0 %v323_v2 }
   0x7   :  { %12 = vsyncpa [#allocation4], 0  ;;  %v325_v7 = vld [vmem:[%s452_s3 + $0x10] sm:$0xff]   ;;  %v326_v8 = vld [vmem:[%s452_s3 + $0x8] sm:$0xff]   ;;  %vm143_vm2 = vcmask 523264   ;;  %s356_s20 = smov [#allocation3]  }
   0x8   :  { %308 = vmatpush3.bf16.msra.mxu1 %v325_v7  ;;  %v327_v9 = vld [vmem:[%s452_s3] sm:$0xff]   ;;  %v109_v24 = vld [vmem:[#allocation2 + $0x8] sm:$0xff]  ;;  %s266_s21 = sshll.u32 %s356_s20, 4  ;;  %s267_s21 = int_to_ptr.vmem [resolvable:$true] %s266_s21 }
   0x9   :  { %302 = vmatmul.mubr.msk.bf16.vlgmr.msra.gmra.mxu0 %vm32_vm1, %v37_v6  ;;  %309 = vmatprep.subr.bf16.mxu1 %v354_v1  ;;  %v277_v10 = vld [vmem:[%s451_s2] ss:$0 sm:$0xff]  ;;  %p337_p1 = scmp.lt.s32.totalorder %s267_s21, %s267_s21 }
   0xa   :  { %v108_v20 = vld [vmem:[#allocation2] sm:$0xff] }
   0xb   :  { %v286_v28 = vld [vmem:[%s453_s4] ss:$0 sm:$0xff] }
   0xc   :  { %310 = vmatpush3.bf16.msra.mxu1 %v326_v8  ;;  %v287_v57 = vld [vmem:[%s454_s5] ss:$0 sm:$0xff]  ;;  %s332_s5 = scalar_lea.vmem %s267_s21, 256 }
   0xd   :  { %311 = vmatprep.subr.bf16.mxu1 %v354_v1  ;;  %v288_v59 = vld [vmem:[%s455_s6] ss:$0 sm:$0xff]  ;;  %p333_p0 = scmp.ne.s32.totalorder %s267_s21, %s332_s5  ;;  %p338_p2 = scmp.lt.s32.totalorder %s332_s5, %s332_s5 }
   0xf   :  { %p339_p3 = por %p338_p2, %p337_p1 }
  0x10   :  { %312 = vmatpush3.bf16.msra.mxu1 %v327_v9 }
  0x11   :  { %p340_p4 = pnand %p339_p3, %p333_p0 }
  0xc9   :  { %v99_v11 = vpop.f32.mrf.mxu0 }
  0xca   :  { %v100_v13 = vadd.f32 %v277_v10, %v99_v11 }
  0xcb   :  { %v303_v12 = vpop.f32.mrf.mxu0 }
  0xcc   :  { %v106_v17 = vmax.f32 %v100_v13, 0.0 }
  0xcd   :  { %v102_v14 = vpop.f32.mrf.mxu0 }
  0xce   :  { %v103_v15 = vadd.f32 %v277_v10, %v102_v14 }
  0xcf   :  { %v304_v16 = vpop.f32.mrf.mxu0 }
  0xd0   :  { %v107_v18 = vmax.f32 %v103_v15, 0.0 }
  0xd2   :  { %v110_v19 = vpack.c.bf16 %v107_v18, %v106_v17 }
  0xd4   :  { %314 = vmatmul.mubr.msk.bf16.vlgmr.msra.gmra.mxu1 %vm143_vm2, %v110_v19 }
 0x194   :  { %v181_v21 = vpop.f32.mrf.mxu1 }
 0x195   :  { %v188_v22 = vadd.f32 %v181_v21, %v108_v20 }
 0x196   :  { %v315_v23 = vpop.f32.mrf.mxu1 }
 0x197   :  { %190 = vst.msk [vmem:[#allocation2] sm:$0xff] %vm32_vm1, %v188_v22 }
 0x198   :  { %v184_v25 = vpop.f32.mrf.mxu1 }
 0x199   :  { %v189_v26 = vadd.f32 %v184_v25, %v109_v24 }
 0x19a   :  { %v316_v27 = vpop.f32.mrf.mxu1 }
 0x19b   :  { %191 = vst.msk [vmem:[#allocation2 + $0x8] sm:$0xff] %vm32_vm1, %v189_v26 }
 0x19e   :  { %v195_v29 = vld [vmem:[#allocation2] sm:$0xff] }
 0x19f   :  { %v204_v30 = vadd.f32 %v286_v28, %v195_v29 }
 0x1a1   :  { %v208_v31 = vadd.f32 %v204_v30, %v35_v3 }
 0x1a2   :  { %v196_v32 = vld [vmem:[#allocation2 + $0x8] sm:$0xff] }
 0x1a3   :  { %v210_v33 = vsel %vm32_vm1, %v208_v31, 0.0  ;;  %v219_v34 = vmul.f32 %v208_v31, %v208_v31  ;;  %v205_v35 = vadd.f32 %v286_v28, %v196_v32 }
 0x1a4   :  { %211 = vadd.xlane.f32.xlu0 %v210_v33 }
 0x1a5   :  { %v221_v36 = vsel %vm32_vm1, %v219_v34, 0.0  ;;  %v209_v37 = vadd.f32 %v205_v35, %v36_v4 }
 0x1a6   :  { %222 = vadd.xlane.f32.xlu1 %v221_v36 }
 0x1a7   :  { %v213_v38 = vsel %vm32_vm1, %v209_v37, 0.0  ;;  %v220_v39 = vmul.f32 %v209_v37, %v209_v37 }
 0x1a8   :  { %214 = vadd.xlane.f32.xlu0 %v213_v38 }
 0x1a9   :  { %v224_v40 = vsel %vm32_vm1, %v220_v39, 0.0 }
 0x1aa   :  { %225 = vadd.xlane.f32.xlu1 %v224_v40 }
 0x22d   :  { %v212_v41 = vpop.xlane.xlu0 %211 }
 0x22e   :  { %v217_v42 = vmul.f32 0.03125, %v212_v41 }
 0x22f   :  { %v223_v43 = vpop.xlane.xlu1 %222 }
 0x230   :  { %v229_v44 = vmul.f32 %v217_v42, %v217_v42  ;;  %v227_v45 = vmul.f32 0.03125, %v223_v43  ;;  %v233_v55 = vsub.f32 %v208_v31, %v217_v42 }
 0x231   :  { %v215_v46 = vpop.xlane.xlu0 %214 }
 0x232   :  { %v231_v47 = vsub.f32 %v227_v45, %v229_v44  ;;  %v218_v48 = vmul.f32 0.03125, %v215_v46 }
 0x233   :  { %v226_v49 = vpop.xlane.xlu1 %225 }
 0x234   :  { %v235_v50 = vadd.f32 1e-05, %v231_v47  ;;  %v230_v51 = vmul.f32 %v218_v48, %v218_v48  ;;  %v228_v52 = vmul.f32 0.03125, %v226_v49  ;;  %v234_v60 = vsub.f32 %v209_v37, %v218_v48 }
 0x236   :  { %328 = vrsqrt.f32 %v235_v50  ;;  %v232_v53 = vsub.f32 %v228_v52, %v230_v51 }
 0x238   :  { %v236_v54 = vadd.f32 1e-05, %v232_v53 }
 0x23a   :  { %330 = vrsqrt.f32 %v236_v54 }
 0x243   :  { %v329_v56 = vpop.eup %328 }
 0x244   :  { %v239_v58 = vmul.f32 %v329_v56, %v233_v55 }
 0x246   :  { %v248_v61 = vmul.f32 %v287_v57, %v239_v58 }
 0x247   :  { %v331_v62 = vpop.eup %330 }
 0x248   :  { %v240_v63 = vmul.f32 %v331_v62, %v234_v60  ;;  %v257_v0 = vadd.f32 %v288_v59, %v248_v61 }
 0x24a   :  { %v249_v1 = vmul.f32 %v287_v57, %v240_v63  ;;  %259 = vst.msk [vmem:[#allocation3] sm:$0xff] %vm32_vm1, %v257_v0 }
 0x24c   :  { %v258_v2 = vadd.f32 %v288_v59, %v249_v1 }
 0x24e   :  { %260 = vst.msk [vmem:[#allocation3 + $0x8] sm:$0xff] %vm32_vm1, %v258_v2 }
 0x24f   :  { %343 = shalt.err (!%p340_p4)
}
 0x250   :  { %s357_s6 = smov 128   ;;  %s358_s22 = smov 8  }
 0x251   :  { %272 = dma.vmem_to_hbm [thread:$0]  %s267_s21, 256, %s456_s7, [#allocation4], %s357_s6, %s357_s6, %s358_s22  }
 0x252   :  { %352 = dma.done.wait [#allocation4], 256  }
 0x253   :  { %353 = vsyncadd [#allocation4], 4294967040 }
 0x254   :  { %276 = vsyncpa [#allocation4], 1 }

</bundles_post_ra>
